<compile_context>
chip_gen: v7x
topology: tpu7x:2x2x1
jax: 0.10.0
libtpu: 0.0.40
codegen_flags: <defaults>
</compile_context>

<pallas_src>
import functools

import jax
import jax.numpy as jnp
from jax.experimental import pallas as pl
from jax.experimental.pallas import tpu as pltpu

_LANE = 128          # vreg lane width (last-dim tiling unit)
_MAX_TILE_N = 512    # node rows per grid step: keeps the ~0.35us/step overhead
                     # negligible while the double-buffered x tile
                     # (2 * 512 * H * 4B) stays a few MiB even for large H --
                     # comfortably inside v7x's 32 MiB scoped / 64 MiB VMEM.


def _round_up(x: int, m: int) -> int:
    return (x + m - 1) // m * m


def prepare_projection(wp, bp):
    """One-time parameter prep (call at model init, NOT per forward pass).

    * Transposes the node_to_graph weight to (H, 2H) so the kernel issues a
      direct (1, H) @ (H, 2H) MXU matmul (no per-call XLA transpose).
    * Zero-pads the graph-feature axis to a multiple of 128 lanes so the
      kernel's output store is lane-dense (unmasked vst); the wrapper slices
      the padding back off.
    """
    g, h = wp.shape
    gp = _round_up(g, _LANE)
    wpt = jnp.zeros((h, gp), wp.dtype).at[:, :g].set(wp.T)
    bpp = jnp.zeros((1, gp), bp.dtype).at[0, :g].set(bp)
    return wpt, bpp


def _graph_embedding_kernel(x_ref, wg_ref, bg_ref, wpt_ref, bp_ref, out_ref,
                            gx_ref, gs_ref, *, num_nodes, tile_n):
    i = pl.program_id(0)

    @pl.when(i == 0)
    def _init():
        gx_ref[...] = jnp.zeros_like(gx_ref)
        gs_ref[...] = jnp.zeros_like(gs_ref)

    # (TN, H) node tile.  Gate / weighted-sum math runs in f32 on the VPU
    # (v5e has no bf16 VALU).  There is no big matmul on x anymore, so no wide
    # upcast intermediate beyond this tile is created.
    x = x_ref[...].astype(jnp.float32)
    wg = wg_ref[...].astype(jnp.float32)                       # (1, H)

    # Gating logits: lane reduction instead of a degenerate (H, 1) matmul.
    logits = jnp.sum(x * wg, axis=-1, keepdims=True) + bg_ref[0, 0]   # (TN, 1)
    gate = jax.nn.sigmoid(logits)

    # Mask rows of a ragged last tile (Pallas pads partial blocks with
    # unspecified data); zeroing the gate kills their contribution to both
    # accumulators.
    row = jax.lax.broadcasted_iota(jnp.int32, gate.shape, 0) + i * tile_n
    gate = jnp.where(row < num_nodes, gate, 0.0)               # (TN, 1) f32

    # Accumulate gate-weighted node sum and total gate mass.
    gx_ref[...] += jnp.sum(gate * x, axis=0, keepdims=True)    # (1, H)
    gs_ref[...] += jnp.sum(gate, axis=0, keepdims=True)        # (1, 1)

    @pl.when(i == pl.num_programs(0) - 1)
    def _finalize():
        # One small MXU matmul: (1, H) @ (H, Gp); bias applied once, scaled by
        # the total gate mass (hoisted out of the N reduction).
        proj = jnp.dot(gx_ref[...], wpt_ref[...],
                       preferred_element_type=jnp.float32)     # (1, Gp)
        bias = gs_ref[...] * bp_ref[...].astype(jnp.float32)   # (1,1)*(1,Gp)
        out_ref[...] = (proj + bias).astype(out_ref.dtype)


def graph_embedding(hidden_states, wg, bg, wpt, bpp, *, out_features=None):
    """Forward pass of GraphEmbedding.

    hidden_states: (N, H) node states.
    wg: (1, H), bg: (1,)       -- node_gating Linear params.
    wpt: (H, Gp), bpp: (1, Gp) -- node_to_graph params from prepare_projection.
    Returns (1, 2H).
    """
    n, h = hidden_states.shape
    gp = wpt.shape[1]
    g = gp if out_features is None else out_features

    # Node tile: full N when small (block == full array dim sidesteps the
    # (8,128) divisibility rule); otherwise 512-row tiles so the pipeline has
    # several steps to overlap DMA/compute and VMEM stays bounded on v7x.
    tile_n = n if n <= _MAX_TILE_N else _MAX_TILE_N
    num_tiles = pl.cdiv(n, tile_n)

    kernel = functools.partial(_graph_embedding_kernel,
                               num_nodes=n, tile_n=tile_n)

    out = pl.pallas_call(
        kernel,
        out_shape=jax.ShapeDtypeStruct((1, gp), hidden_states.dtype),
        grid_spec=pltpu.PrefetchScalarGridSpec(
            num_scalar_prefetch=0,
            grid=(num_tiles,),
            in_specs=[
                # Node tiles: the only operand streamed over the grid.
                pl.BlockSpec((tile_n, h), lambda i: (i, 0)),
                # Gating weight: constant block (fetched once, index fixed).
                pl.BlockSpec((1, h), lambda i: (0, 0)),
                # Gating bias: scalar in SMEM (a (1,1) VMEM block would burn a
                # padded 8x128 tile and a vector-load slot).
                pl.BlockSpec(memory_space=pltpu.MemorySpace.SMEM),
                # Projection weight (pre-transposed, lane-padded) and bias.
                pl.BlockSpec((h, gp), lambda i: (0, 0)),
                pl.BlockSpec((1, gp), lambda i: (0, 0)),
            ],
            out_specs=pl.BlockSpec((1, gp), lambda i: (0, 0)),
            scratch_shapes=[
                pltpu.VMEM((1, h), jnp.float32),   # gate-weighted node sum
                pltpu.VMEM((1, 1), jnp.float32),   # sum of gates
            ],
        ),
        compiler_params=pltpu.CompilerParams(
            # Single grid axis is the N reduction -> "arbitrary".
            # TODO(synk): if many graphs are embedded per step, add a leading
            # "parallel" batch grid axis to use both v7x TensorCores.
            dimension_semantics=("arbitrary",)),
    )(hidden_states, wg, jnp.reshape(bg, (1, 1)), wpt, bpp)

    return out[:, :g]


if __name__ == "__main__":
    node_hidden_size = 32            # H
    graph_hidden_size = 2 * node_hidden_size
    num_nodes = 8                    # N

    key = jax.random.PRNGKey(0)
    k_x, k_wg, k_bg, k_wp, k_bp = jax.random.split(key, 5)

    x = jax.random.normal(k_x, (num_nodes, node_hidden_size), dtype=jnp.float32)
    # Deterministic synthetic params mimicking the Linear layer shapes.
    wg = jax.random.normal(k_wg, (1, node_hidden_size), dtype=jnp.float32) * 0.1
    bg = jax.random.normal(k_bg, (1,), dtype=jnp.float32) * 0.1
    wp = jax.random.normal(k_wp, (graph_hidden_size, node_hidden_size),
                           dtype=jnp.float32) * 0.1
    bp = jax.random.normal(k_bp, (graph_hidden_size,), dtype=jnp.float32) * 0.1

    # One-time parameter prep (transpose + lane-pad), as a model would at init.
    wpt, bpp = prepare_projection(wp, bp)

    out = graph_embedding(x, wg, bg, wpt, bpp, out_features=graph_hidden_size)
    out = jax.block_until_ready(out)

    # Pure-JAX reference of the original PyTorch semantics.
    gate_ref = jax.nn.sigmoid(x @ wg.T + bg)                # (N, 1)
    proj_ref = x @ wp.T + bp                                # (N, 2H)
    ref = jnp.sum(gate_ref * proj_ref, axis=0, keepdims=True)
    assert out.shape == (1, graph_hidden_size)
    assert jnp.allclose(out, ref, atol=1e-4, rtol=1e-4), \
        f"max abs err {jnp.max(jnp.abs(out - ref))}"

    print("KERNEL_OK")
</pallas_src>

<mosaic_0001>
module attributes {stable_mosaic.version = 11 : i64} {
  func.func @_graph_embedding_kernel(%arg0: i32, %arg1: memref<8x32xf32, #tpu.memory_space<vmem>>, %arg2: memref<1x32xf32, #tpu.memory_space<vmem>>, %arg3: memref<1x1xf32, #tpu.memory_space<smem>>, %arg4: memref<32x128xf32, #tpu.memory_space<vmem>>, %arg5: memref<1x128xf32, #tpu.memory_space<vmem>>, %arg6: memref<1x128xf32, #tpu.memory_space<vmem>>, %arg7: memref<1x32xf32, #tpu.memory_space<vmem>>, %arg8: memref<1x1xf32, #tpu.memory_space<vmem>>) attributes {dimension_semantics = [#tpu.dimension_semantics<arbitrary>], iteration_bounds = array<i64: 1>, scalar_prefetch = 0 : i64, scratch_operands = 2 : i64, tpu.core_type = #tpu.core_type<tc>, window_params = [{transform_indices = @transform_0, window_bounds = array<i64: 8, 32>}, {pipeline_mode = #tpu.pipeline_mode<synchronous>, transform_indices = @transform_1, window_bounds = array<i64: 1, 32>}, {transform_indices = @transform_2, window_bounds = array<i64: 1, 1>}, {pipeline_mode = #tpu.pipeline_mode<synchronous>, transform_indices = @transform_3, window_bounds = array<i64: 32, 128>}, {pipeline_mode = #tpu.pipeline_mode<synchronous>, transform_indices = @transform_4, window_bounds = array<i64: 1, 128>}, {pipeline_mode = #tpu.pipeline_mode<synchronous>, transform_indices = @transform_5, window_bounds = array<i64: 1, 128>}]} {
    %c0_i32 = arith.constant 0 : i32
    %0 = arith.cmpi eq, %arg0, %c0_i32 : i32
    %1 = arith.extui %0 : i1 to i32
    %c0_i32_0 = arith.constant 0 : i32
    %2 = arith.cmpi ne, %1, %c0_i32_0 : i32
    scf.if %2 {
      %cst_21 = arith.constant 0.000000e+00 : f32
      %40 = vector.broadcast %cst_21 : f32 to vector<1x32xf32>
      %c0_22 = arith.constant 0 : index
      %c0_23 = arith.constant 0 : index
      %41 = vector.load %arg7[%c0_22, %c0_23] : memref<1x32xf32, #tpu.memory_space<vmem>>, vector<1x32xf32>
      tpu.vector_store %arg7[%c0_22, %c0_23], %40 {strides = array<i32>} : memref<1x32xf32, #tpu.memory_space<vmem>>, vector<1x32xf32>,
      %cst_24 = arith.constant 0.000000e+00 : f32
      %42 = vector.broadcast %cst_24 : f32 to vector<1x1xf32>
      %c0_25 = arith.constant 0 : index
      %c0_26 = arith.constant 0 : index
      %43 = vector.load %arg8[%c0_25, %c0_26] : memref<1x1xf32, #tpu.memory_space<vmem>>, vector<1x1xf32>
      tpu.vector_store %arg8[%c0_25, %c0_26], %42 {strides = array<i32>} : memref<1x1xf32, #tpu.memory_space<vmem>>, vector<1x1xf32>,
    } else {
    }
    %c0 = arith.constant 0 : index
    %c0_1 = arith.constant 0 : index
    %3 = vector.load %arg1[%c0, %c0_1] : memref<8x32xf32, #tpu.memory_space<vmem>>, vector<8x32xf32>
    %c0_2 = arith.constant 0 : index
    %c0_3 = arith.constant 0 : index
    %4 = vector.load %arg2[%c0_2, %c0_3] : memref<1x32xf32, #tpu.memory_space<vmem>>, vector<1x32xf32>
    %5 = vector.broadcast %4 : vector<1x32xf32> to vector<8x32xf32>
    %6 = arith.mulf %3, %5 : vector<8x32xf32>
    %cst = arith.constant dense<0.000000e+00> : vector<8xf32>
    %7 = vector.multi_reduction <add>, %6, %cst [1] : vector<8x32xf32> to vector<8xf32>
    %8 = vector.shape_cast %7 : vector<8xf32> to vector<8x1xf32>
    %c0_4 = arith.constant 0 : index
    %c0_5 = arith.constant 0 : index
    %9 = memref.load %arg3[%c0_4, %c0_5] : memref<1x1xf32, #tpu.memory_space<smem>>
    %10 = vector.broadcast %9 : f32 to vector<8x1xf32>
    %11 = arith.addf %8, %10 : vector<8x1xf32>
    %12 = arith.negf %11 : vector<8x1xf32>
    %13 = math.exp %12 : vector<8x1xf32>
    %cst_6 = arith.constant 1.000000e+00 : f32
    %14 = vector.broadcast %cst_6 : f32 to vector<8x1xf32>
    %15 = arith.addf %14, %13 : vector<8x1xf32>
    %16 = arith.divf %14, %15 : vector<8x1xf32>
    %17 = tpu.iota {dimensions = array<i32: 0>} : vector<8x1xi32>
    %c8_i32 = arith.constant 8 : i32
    %18 = arith.muli %arg0, %c8_i32 : i32
    %19 = vector.broadcast %18 : i32 to vector<8x1xi32>
    %20 = arith.addi %17, %19 : vector<8x1xi32>
    %c8_i32_7 = arith.constant 8 : i32
    %21 = vector.broadcast %c8_i32_7 : i32 to vector<8x1xi32>
    %22 = arith.cmpi slt, %20, %21 : vector<8x1xi32>
    %cst_8 = arith.constant 0.000000e+00 : f32
    %23 = vector.broadcast %cst_8 : f32 to vector<8x1xf32>
    %24 = arith.select %22, %16, %23 : vector<8x1xi1>, vector<8x1xf32>
    %c0_9 = arith.constant 0 : index
    %c0_10 = arith.constant 0 : index
    %25 = vector.load %arg7[%c0_9, %c0_10] : memref<1x32xf32, #tpu.memory_space<vmem>>, vector<1x32xf32>
    %26 = vector.broadcast %24 : vector<8x1xf32> to vector<8x32xf32>
    %27 = arith.mulf %26, %3 : vector<8x32xf32>
    %cst_11 = arith.constant dense<0.000000e+00> : vector<32xf32>
    %28 = vector.multi_reduction <add>, %27, %cst_11 [0] : vector<8x32xf32> to vector<32xf32>
    %29 = vector.shape_cast %28 : vector<32xf32> to vector<1x32xf32>
    %30 = arith.addf %25, %29 : vector<1x32xf32>
    %c0_12 = arith.constant 0 : index
    %c0_13 = arith.constant 0 : index
    %31 = vector.load %arg7[%c0_12, %c0_13] : memref<1x32xf32, #tpu.memory_space<vmem>>, vector<1x32xf32>
    tpu.vector_store %arg7[%c0_12, %c0_13], %30 {strides = array<i32>} : memref<1x32xf32, #tpu.memory_space<vmem>>, vector<1x32xf32>,
    %c0_14 = arith.constant 0 : index
    %c0_15 = arith.constant 0 : index
    %32 = vector.load %arg8[%c0_14, %c0_15] : memref<1x1xf32, #tpu.memory_space<vmem>>, vector<1x1xf32>
    %cst_16 = arith.constant dense<0.000000e+00> : vector<1xf32>
    %33 = vector.multi_reduction <add>, %24, %cst_16 [0] : vector<8x1xf32> to vector<1xf32>
    %34 = vector.shape_cast %33 : vector<1xf32> to vector<1x1xf32>
    %35 = arith.addf %32, %34 : vector<1x1xf32>
    %c0_17 = arith.constant 0 : index
    %c0_18 = arith.constant 0 : index
    %36 = vector.load %arg8[%c0_17, %c0_18] : memref<1x1xf32, #tpu.memory_space<vmem>>, vector<1x1xf32>
    tpu.vector_store %arg8[%c0_17, %c0_18], %35 {strides = array<i32>} : memref<1x1xf32, #tpu.memory_space<vmem>>, vector<1x1xf32>,
    %c0_i32_19 = arith.constant 0 : i32
    %37 = arith.cmpi eq, %arg0, %c0_i32_19 : i32
    %38 = arith.extui %37 : i1 to i32
    %c0_i32_20 = arith.constant 0 : i32
    %39 = arith.cmpi ne, %38, %c0_i32_20 : i32
    scf.if %39 {
      %c0_21 = arith.constant 0 : index
      %c0_22 = arith.constant 0 : index
      %40 = vector.load %arg7[%c0_21, %c0_22] : memref<1x32xf32, #tpu.memory_space<vmem>>, vector<1x32xf32>
      %c0_23 = arith.constant 0 : index
      %c0_24 = arith.constant 0 : index
      %41 = vector.load %arg4[%c0_23, %c0_24] : memref<32x128xf32, #tpu.memory_space<vmem>>, vector<32x128xf32>
      %cst_25 = arith.constant dense<0.000000e+00> : vector<1x128xf32>
      %42 = tpu.matmul %40, %41, %cst_25 {dimension_numbers = #tpu.dot_dimension_numbers<[1], [0], [0], [1], [0, 0, 1, 1], [], []>} : vector<1x32xf32>, vector<32x128xf32>, vector<1x128xf32> -> vector<1x128xf32>
      %c0_26 = arith.constant 0 : index
      %c0_27 = arith.constant 0 : index
      %43 = vector.load %arg8[%c0_26, %c0_27] : memref<1x1xf32, #tpu.memory_space<vmem>>, vector<1x1xf32>
      %c0_28 = arith.constant 0 : index
      %c0_29 = arith.constant 0 : index
      %44 = vector.load %arg5[%c0_28, %c0_29] : memref<1x128xf32, #tpu.memory_space<vmem>>, vector<1x128xf32>
      %45 = vector.broadcast %43 : vector<1x1xf32> to vector<1x128xf32>
      %46 = arith.mulf %45, %44 : vector<1x128xf32>
      %47 = arith.addf %42, %46 : vector<1x128xf32>
      %c0_30 = arith.constant 0 : index
      %c0_31 = arith.constant 0 : index
      %48 = vector.load %arg6[%c0_30, %c0_31] : memref<1x128xf32, #tpu.memory_space<vmem>>, vector<1x128xf32>
      tpu.vector_store %arg6[%c0_30, %c0_31], %47 {strides = array<i32>} : memref<1x128xf32, #tpu.memory_space<vmem>>, vector<1x128xf32>,
    } else {
    }
    return
  }
  func.func @transform_0(%arg0: i32) -> (i32, i32) {
    %c0_i32 = arith.constant 0 : i32
    %c0_i32_0 = arith.constant 0 : i32
    return %arg0, %c0_i32 : i32, i32
  }
  func.func @transform_1(%arg0: i32) -> (i32, i32) {
    %c0_i32 = arith.constant 0 : i32
    %c0_i32_0 = arith.constant 0 : i32
    %c0_i32_1 = arith.constant 0 : i32
    return %c0_i32, %c0_i32_0 : i32, i32
  }
  func.func @transform_2(%arg0: i32) -> (i32, i32) {
    %c0_i32 = arith.constant 0 : i32
    %c0_i32_0 = arith.constant 0 : i32
    %c0_i32_1 = arith.constant 0 : i32
    return %c0_i32, %c0_i32_0 : i32, i32
  }
  func.func @transform_3(%arg0: i32) -> (i32, i32) {
    %c0_i32 = arith.constant 0 : i32
    %c0_i32_0 = arith.constant 0 : i32
    %c0_i32_1 = arith.constant 0 : i32
    return %c0_i32, %c0_i32_0 : i32, i32
  }
  func.func @transform_4(%arg0: i32) -> (i32, i32) {
    %c0_i32 = arith.constant 0 : i32
    %c0_i32_0 = arith.constant 0 : i32
    %c0_i32_1 = arith.constant 0 : i32
    return %c0_i32, %c0_i32_0 : i32, i32
  }
  func.func @transform_5(%arg0: i32) -> (i32, i32) {
    %c0_i32 = arith.constant 0 : i32
    %c0_i32_0 = arith.constant 0 : i32
    %c0_i32_1 = arith.constant 0 : i32
    return %c0_i32, %c0_i32_0 : i32, i32
  }
}

</mosaic_0001>

<bundles_post_ra>
// kernel: tpu_custom_call.1
= control target key start
LH: loop header
LB: loop body
LE: loop exit
PB: predicated region body
PF: predicated region fallthrough
CT: control target
= control target key end

     0   :  { %11 = vsyncpa [#allocation6], 0  ;;  %s426_s0 = inlined_call_operand.hbm [shape: f32[8,32], index: 0, kind: input, shape index: {}]   ;;  %s427_s1 = inlined_call_operand.vmem [shape: f32[1,32], index: 1, kind: input, shape index: {}]   ;;  %s428_s2 = inlined_call_operand.<no memory space> [shape: f32[1,1], index: 2, kind: input, shape index: {}]   ;;  %s429_s3 = inlined_call_operand.hbm [shape: f32[32,128], index: 3, kind: input, shape index: {}]   ;;  %s430_s4 = inlined_call_operand.vmem [shape: f32[1,128], index: 4, kind: input, shape index: {}]   ;;  %s431_s5 = inlined_call_operand.hbm [shape: f32[1,128], index: 5, kind: output, shape index: {}]  }
   0x1   :  { %12 = vsyncpa [#allocation9], 0 }
   0x2   :  { %13 = vsyncpa [#allocation7], 0  ;;  %s328_s18 = smov [#allocation5]   ;;  %s329_s20 = smov [#allocation8]  }
   0x3   :  { %s20_s19 = sshll.u32 %s328_s18, 4  ;;  %s33_s21 = sshll.u32 %s329_s20, 4  ;;  %s21_s19 = int_to_ptr.vmem [resolvable:$true] %s20_s19  ;;  %s367_s21 = int_to_ptr.vmem [resolvable:$true] %s33_s21 }
   0x4   :  { %s256_s24 = scalar_lea.hbm %s426_s0, 128 }
   0x5   :  { %p257_p0 = scmp.ne.s32.totalorder %s426_s0, %s256_s24  ;;  %p260_p1 = scmp.lt.u32.totalorder %s256_s24, %s426_s0 }
   0x7   :  { %p262_p2 = pnand %p260_p1, %p257_p0 }
   0x9   :  { %265 = shalt.err (!%p262_p2)
}
   0xa   :  { %s266_s29 = scalar_lea.vmem %s21_s19, 128  ;;  %p271_p4 = scmp.lt.s32.totalorder %s21_s19, %s21_s19 }
   0xb   :  { %p267_p3 = scmp.ne.s32.totalorder %s21_s19, %s266_s29  ;;  %p272_p5 = scmp.lt.s32.totalorder %s266_s29, %s266_s29 }
   0xd   :  { %p273_p6 = por %p272_p5, %p271_p4 }
   0xf   :  { %p274_p7 = pnand %p273_p6, %p267_p3 }
  0x11   :  { %277 = shalt.err (!%p274_p7)
}
  0x12   :  { %23 = dma.hbm_to_vmem [thread:$0]  %s426_s0, 128, %s21_s19, [#allocation6]  }
  0x13   :  { %s278_s9 = scalar_lea.hbm %s429_s3, 512 }
  0x14   :  { %p279_p8 = scmp.ne.s32.totalorder %s429_s3, %s278_s9  ;;  %p282_p9 = scmp.lt.u32.totalorder %s278_s9, %s429_s3 }
  0x16   :  { %p284_p10 = pnand %p282_p9, %p279_p8 }
  0x18   :  { %287 = shalt.err (!%p284_p10)
}
  0x19   :  { %s288_s14 = scalar_lea.vmem %s367_s21, 512  ;;  %p293_p12 = scmp.lt.s32.totalorder %s367_s21, %s367_s21 }
  0x1a   :  { %p289_p11 = scmp.ne.s32.totalorder %s367_s21, %s288_s14  ;;  %p294_p13 = scmp.lt.s32.totalorder %s288_s14, %s288_s14 }
  0x1c   :  { %p295_p0 = por %p294_p13, %p293_p12 }
  0x1e   :  { %p296_p1 = pnand %p295_p0, %p289_p11 }
  0x20   :  { %299 = shalt.err (!%p296_p1)
}
  0x21   :  { %s330_s0 = smov 128   ;;  %s331_s15 = smov 8  }
  0x22   :  { %39 = dma.hbm_to_vmem [thread:$0]  %s429_s3, 512, %s367_s21, [#allocation9], %s330_s0, %s330_s0, %s331_s15  }
  0x23   :  { %322 = dma.done.wait [#allocation6], 128  }
  0x24   :  { %323 = vsyncadd [#allocation6], 4294967168 }
  0x25   :  { %324 = dma.done.wait [#allocation9], 512  }
  0x26   :  { %325 = vsyncadd [#allocation9], 4294966784  ;;  %vm52_vm0 = vcmask 253952   ;;  %vm54_vm1 = vcmask 0   ;;  %v332_v0 = vmov 0.0   ;;  %v56_v1 = vld [vmem:[#allocation5] sm:$0xff]  ;;  %v70_v13 = vstv %s428_s2 }
  0x27   :  { %53 = vst.msk [vmem:[#allocation2] sm:$0x1] %vm52_vm0, %v332_v0  ;;  %v217_v2 = vld [vmem:[%s427_s1] ss:$0 sm:$0xff]  ;;  %vm65_vm2 = vcmask 261120   ;;  %v111_v5 = vld [vmem:[#allocation8] sm:$0xff]  ;;  %v122_v40 = vlaneseq }
  0x28   :  { %55 = vst.msk [vmem:[#allocation3] sm:$0x1] %vm54_vm1, %v332_v0  ;;  %v64_v3 = vmul.f32 %v217_v2, %v56_v1  ;;  %v112_v6 = vld [vmem:[#allocation8 + $0x8] sm:$0xff]  ;;  %v333_v8 = vmov 0.0|0.0   ;;  %v113_v9 = vld [vmem:[#allocation8 + $0x10] sm:$0xff]  ;;  %v114_v10 = vld [vmem:[#allocation8 + $0x18] sm:$0xff] }
  0x29   :  { %v237_v7 = vpack.c.bf16 %v112_v6, %v111_v5  ;;  %236 = vmatprep.subr.bf16.mxu0 %v333_v8  ;;  %v334_v11 = vmov 0   ;;  %v240_v12 = vpack.c.bf16 %v114_v10, %v113_v9  ;;  %vm335_vm3 = vmmov 0   ;;  %v116_v45 = vld [vmem:[%s430_s4] sm:$0x1]  ;;  %s336_s21 = smov [#allocation10]  }
  0x2a   :  { %v66_v4 = vsel %vm65_vm2, %v64_v3, 0.0  ;;  %251 = vset.pattern.permute.xlu0 %v334_v11  ;;  %233 = vmatprep.mubr.msk.f32.mxu0 %vm335_vm3, %v332_v0  ;;  %v123_v41 = vshrl.u32 %v122_v40, 7  ;;  %s207_s22 = sshll.u32 %s336_s21, 4  ;;  %s208_s22 = int_to_ptr.vmem [resolvable:$true] %s207_s22 }
  0x2b   :  { %67 = vadd.xlane.f32.xlu0 %v66_v4  ;;  %238 = vmatpush3.bf16.msra.mxu0 %v237_v7  ;;  %s300_s23 = scalar_lea.vmem %s208_s22, 16  ;;  %s304_s24 = scalar_lea.vmem %s208_s22, 32 }
  0x2c   :  { %239 = vmatprep.subr.bf16.mxu0 %v333_v8  ;;  %v124_v42 = vsub.s32 0, %v123_v41  ;;  %p301_p2 = scmp.ne.s32.totalorder %s208_s22, %s300_s23  ;;  %p305_p3 = scmp.lt.s32.totalorder %s208_s22, %s208_s22 }
  0x2d   :  { %p306_p4 = scmp.lt.s32.totalorder %s304_s24, %s300_s23 }
  0x2e   :  { %v85_v34 = vld [vmem:[#allocation2] sm:$0x1] }
  0x2f   :  { %241 = vmatpush3.bf16.msra.mxu0 %v240_v12  ;;  %v97_v31 = vld [vmem:[#allocation3] sm:$0x1]  ;;  %p307_p5 = por %p306_p4, %p305_p3 }
  0x31   :  { %p308_p6 = pnand %p307_p5, %p301_p2 }
  0xb8   :  { %v68_v14 = vpop.xlane.xlu0 %67 }
  0xb9   :  { %v71_v15 = vadd.f32 %v70_v13, %v68_v14 }
  0xbb   :  { %v218_v16 = vmul.f32 -1.442695, %v71_v15 }
  0xbd   :  { %252 = vpow2.f32 %v218_v16 }
  0xc7   :  { %v253_v17 = vpop.eup %252 }
  0xc8   :  { %v75_v18 = vadd.f32 1.0, %v253_v17 }
  0xca   :  { %254 = vrcp.f32 %v75_v18 }
  0xd4   :  { %v255_v19 = vpop.eup %254 }
  0xd5   :  { %v86_v20 = vmul.f32 %v255_v19, %v56_v1  ;;  %v98_v21 = vrot.slane %v255_v19, 4 }
  0xd7   :  { %v87_v22 = vsel %vm65_vm2, %v86_v20, 0.0  ;;  %v99_v23 = vadd.f32 %v255_v19, %v98_v21 }
  0xd8   :  { %v88_v24 = vrot.slane %v87_v22, 4 }
  0xd9   :  { %v100_v25 = vrot.slane %v99_v23, 2 }
  0xda   :  { %v89_v26 = vadd.f32 %v88_v24, %v87_v22 }
  0xdb   :  { %v101_v27 = vadd.f32 %v100_v25, %v99_v23 }
  0xdc   :  { %v90_v28 = vrot.slane %v89_v26, 2 }
  0xdd   :  { %v102_v29 = vrot.slane %v101_v27, 1 }
  0xde   :  { %v91_v30 = vadd.f32 %v90_v28, %v89_v26 }
  0xdf   :  { %v103_v32 = vadd.f32 %v102_v29, %v101_v27 }
  0xe0   :  { %v92_v33 = vrot.slane %v91_v30, 1 }
  0xe1   :  { %v104_v35 = vadd.f32 %v103_v32, %v97_v31 }
  0xe2   :  { %v93_v36 = vadd.f32 %v92_v33, %v91_v30 }
  0xe3   :  { %106 = vst.msk [vmem:[#allocation3] sm:$0x1] %vm54_vm1, %v104_v35 }
  0xe4   :  { %v94_v37 = vadd.f32 %v93_v36, %v85_v34 }
  0xe6   :  { %96 = vst.msk [vmem:[#allocation2] sm:$0x1] %vm52_vm0, %v94_v37 }
  0xea   :  { %v115_v38 = vld [vmem:[#allocation3] sm:$0x1] }
  0xeb   :  { %119 = vperm.xlu0 %251, %v115_v38  }
  0xed   :  { %v110_v39 = vld [vmem:[#allocation2] sm:$0x1] }
  0xee   :  { %234 = vmatmul.mubr.msk.f32.vlgmr.msra.gmra.mrb[0].mxu0 %vm65_vm2, %v110_v39 }
 0x16a   :  { %v120_v43 = vpop.permute.xlu0 %119 }
 0x16b   :  { %v125_v44 = vrot.slane %v120_v43, %v124_v42 }
 0x16d   :  { %v126_v46 = vmul.f32 %v125_v44, %v116_v45 }
 0x1c1   :  { %v196_v47 = vpop.f32.mrb[0].mxu0 }
 0x1c2   :  { %v197_v48 = vadd.f32 %v196_v47, %v126_v46  ;;  %v235_v49 = vpop.f32.mrb[1].mxu0 }
 0x1c4   :  { %200 = vst [vmem:[#allocation10] sm:$0x1] %v197_v48 }
 0x1c5   :  { %311 = shalt.err (!%p308_p6)
}
 0x1c6   :  { %s312_s4 = scalar_lea.hbm %s431_s5, 16 }
 0x1c7   :  { %p313_p7 = scmp.ne.s32.totalorder %s431_s5, %s312_s4  ;;  %p316_p8 = scmp.lt.u32.totalorder %s312_s4, %s431_s5 }
 0x1c9   :  { %p318_p9 = pnand %p316_p8, %p313_p7 }
 0x1cb   :  { %321 = shalt.err (!%p318_p9)
}
 0x1cc   :  { %210 = dma.vmem_to_hbm [thread:$0]  %s208_s22, 16, %s431_s5, [#allocation7]  }
 0x1cd   :  { %326 = dma.done.wait [#allocation7], 16  }
 0x1ce   :  { %327 = vsyncadd [#allocation7], 4294967280 }
 0x1cf   :  { %214 = vsyncpa [#allocation6], 1 }
 0x1d0   :  { %215 = vsyncpa [#allocation9], 1 }
 0x1d1   :  { %216 = vsyncpa [#allocation7], 1 }

</bundles_post_ra>
